<compile_context>
chip_gen: v6e
topology: v6e:2x2x1
jax: 0.10.0
libtpu: 0.0.40
codegen_flags: <defaults>
</compile_context>

<pallas_src>
import numpy as np
import jax
import jax.numpy as jnp
from jax import lax
from jax.experimental import pallas as pl
from jax.experimental.pallas import tpu as pltpu


# ----------------------------------------------------------------------------
# dtk helper: total "same" padding (module uses same_padding(k, stride) // 2)
# ----------------------------------------------------------------------------
def same_padding(kernel_size, stride):
    return max(kernel_size - stride, 0)


def _round_up(v, m):
    return ((v + m - 1) // m) * m


def _vmem_capacity_bytes():
    try:
        return int(pltpu.get_tpu_info().vmem_capacity_bytes)
    except Exception:
        return 64 * 1024 * 1024        # conservative default (v7x per-TC VMEM)


# ----------------------------------------------------------------------------
# Pallas kernel factory
#   s_ref   : (1, 1, CKK_p)     per-batch modulation (s[ci]+1), cols = (ky,kx,ci)
#   x_ref   : (1, C_in_p, FL)   flattened zero-padded input for this batch (bf16)
#   w_ref   : (Cout, CKK_p)     shared weight (f32), cols ordered (ky, kx, ci)
#   o_ref   : (1, Cout, TM)     flat padded-width output tile (f32)
#   wmod_ref: (Cout, CKK_p)     per-batch modulated weight cache (compute dtype)
#   patch   : (CKK_p, TM)       im2col scratch (only in the fused-patch path)
# ----------------------------------------------------------------------------
def _make_conv2dmod_kernel(C_in_p, CKK_p, C_out, TM, n_tiles, tap_offsets,
                           demod, eps, use_patch, compute_dtype):
    def body(s_ref, x_ref, w_ref, o_ref, wmod_ref, patch_ref):
        # ---- per-batch weight modulation/demodulation (hoisted, cached) ----
        # Recomputed only on the first spatial tile of each batch element.
        # Demod sum + rsqrt stay in f32; only the cached copy is bf16.
        @pl.when(pl.program_id(1) == 0)
        def _():
            w_mod = w_ref[...] * s_ref[0]                          # f32 (Cout, CKK_p)
            if demod:
                ssum = jnp.sum(w_mod * w_mod, axis=1, keepdims=True) + eps
                w_mod = w_mod * lax.rsqrt(ssum)                    # EUP rsqrt, f32
            wmod_ref[...] = w_mod.astype(compute_dtype)

        # Flat base offset of this output tile (lane-aligned).
        if n_tiles == 1:
            base = 0                                               # fully static
        else:
            base = pl.multiple_of(pl.program_id(1) * TM, 128)

        if use_patch:
            # Small C_in: im2col patch (rows ordered (ky,kx,ci), sublane-aligned
            # because C_in_p is a multiple of the packing), then one fused MXU
            # matmul (Cout, CKK_p) @ (CKK_p, TM) with deep contraction.
            for t, off in enumerate(tap_offsets):
                patch_ref[t * C_in_p:(t + 1) * C_in_p, :] = \
                    x_ref[0, :, pl.ds(base + off, TM)]
            o_ref[0] = jnp.dot(wmod_ref[...], patch_ref[...],
                               preferred_element_type=jnp.float32
                               ).astype(o_ref.dtype)
        else:
            # Large C_in: K*K per-tap matmuls accumulated in f32 -- no patch
            # scratch and no patch store/reload through the vst/vld slots.
            acc = jnp.zeros((C_out, TM), jnp.float32)
            for t, off in enumerate(tap_offsets):
                acc = acc + jnp.dot(
                    wmod_ref[:, t * C_in_p:(t + 1) * C_in_p],
                    x_ref[0, :, pl.ds(base + off, TM)],
                    preferred_element_type=jnp.float32)
            o_ref[0] = acc.astype(o_ref.dtype)

    if use_patch:
        def kernel(s_ref, x_ref, w_ref, o_ref, wmod_ref, patch_ref):
            body(s_ref, x_ref, w_ref, o_ref, wmod_ref, patch_ref)
    else:
        def kernel(s_ref, x_ref, w_ref, o_ref, wmod_ref):
            body(s_ref, x_ref, w_ref, o_ref, wmod_ref, None)
    return kernel


# ----------------------------------------------------------------------------
# Wrapper: layout prep (cheap XLA pads/reshapes), pallas_call, un-padding
# ----------------------------------------------------------------------------
def conv2dmod_pallas(x, s, weight, kernel, stride=1, demod=True, eps=1e-8,
                     use_bf16=True, force_tap_path=False):
    """x: (N, Cin, H, W) f32, s: (N, Cin) f32, weight: (Cout, Cin, K, K) f32."""
    N, C_in, H, W = x.shape
    C_out = weight.shape[0]
    K = int(kernel)
    pad = same_padding(K, stride) // 2

    compute_dtype = jnp.bfloat16 if use_bf16 else jnp.float32
    csize = 2 if use_bf16 else 4
    sub = 16 if use_bf16 else 8                 # sublane packing of compute dtype

    H_p, W_p = H + 2 * pad, W + 2 * pad
    H_out, W_out = H_p - K + 1, W_p - K + 1

    # Pad C_in so every tap's patch-row block / weight-column slice is
    # sublane-aligned.  Zero-padded channels contribute nothing (weight rows
    # are zero, so modulation and the demod sum are unchanged).
    C_in_p = _round_up(C_in, sub)
    CKK_p = C_in_p * K * K

    # Flattened padded-width output: valid length M, tiled into lane-dense TM.
    M = H_out * W_p
    d_max = (K - 1) * W_p + (K - 1)             # largest tap offset (halo)

    vmem_cap = _vmem_capacity_bytes()
    limit_cap = int(0.9 * vmem_cap)             # leave headroom below physical

    # Start with a large lane-dense tile (amortizes per-grid-step overhead) and
    # shrink until the derived VMEM budget fits this generation's capacity.
    TM = min(2048, _round_up(M, 128))
    while True:
        n_tiles = pl.cdiv(M, TM)
        M_pad = n_tiles * TM
        FL = _round_up(M_pad + d_max, 128)      # flat input length (+ halo)
        use_patch = ((not force_tap_path) and C_in_p < 128
                     and CKK_p * TM * csize <= (8 << 20))
        need = (2 * C_in_p * FL * csize         # x block (double-buffered)
                + 2 * C_out * CKK_p * 4         # weight (f32, double-buffered)
                + 2 * CKK_p * 4                 # s_exp
                + 2 * C_out * TM * 4            # output tile (double-buffered)
                + C_out * CKK_p * (csize + 4)   # w_mod cache + f32 build temp
                + (CKK_p * TM * csize if use_patch else C_out * TM * 4))
        if need <= limit_cap or TM <= 128:
            break
        TM = max(128, _round_up(TM // 2, 128))
    vmem_limit = int(min(limit_cap, max(32 << 20, int(1.3 * need) + (4 << 20))))

    # Pad channels + spatial, flatten (H, W), zero-pad the flat tail.
    x_sp = jnp.pad(x, ((0, 0), (0, C_in_p - C_in), (pad, pad), (pad, pad)))
    x_flat = x_sp.reshape(N, C_in_p, H_p * W_p)
    x_flat = jnp.pad(x_flat, ((0, 0), (0, 0), (0, FL - H_p * W_p)))
    x_flat = x_flat.astype(compute_dtype)

    # Weight with columns ordered (ky, kx, ci): (Cout, K*K*C_in_p), kept f32
    # so the in-kernel demodulation runs at full precision.
    w_p = jnp.pad(weight.astype(jnp.float32),
                  ((0, 0), (0, C_in_p - C_in), (0, 0), (0, 0)))
    w2 = jnp.transpose(w_p, (0, 2, 3, 1)).reshape(C_out, CKK_p)

    # Per-column modulation (s[b, ci] + 1), tiled over the K*K taps.
    s_p = jnp.pad(s.astype(jnp.float32), ((0, 0), (0, C_in_p - C_in)))
    s_exp = jnp.tile(s_p + 1.0, (1, K * K)).reshape(N, 1, CKK_p)

    taps = tuple(ky * W_p + kx for ky in range(K) for kx in range(K))
    kern = _make_conv2dmod_kernel(C_in_p, CKK_p, C_out, TM, n_tiles, taps,
                                  bool(demod), float(eps), use_patch,
                                  compute_dtype)

    scratch = [pltpu.VMEM((C_out, CKK_p), compute_dtype)]          # w_mod cache
    if use_patch:
        scratch.append(pltpu.VMEM((CKK_p, TM), compute_dtype))     # im2col patch

    flops = 2 * N * n_tiles * C_out * CKK_p * TM
    bytes_accessed = (x_flat.size * csize + w2.size * 4 + s_exp.size * 4
                      + N * C_out * M_pad * 4)
    cost = pl.CostEstimate(flops=flops, transcendentals=N * C_out,
                           bytes_accessed=bytes_accessed)

    out_flat = pl.pallas_call(
        kern,
        out_shape=jax.ShapeDtypeStruct((N, C_out, M_pad), x.dtype),
        grid_spec=pltpu.PrefetchScalarGridSpec(
            num_scalar_prefetch=0,
            grid=(N, n_tiles),
            in_specs=[
                pl.BlockSpec((1, 1, CKK_p), lambda n, i: (n, 0, 0)),    # s_exp
                pl.BlockSpec((1, C_in_p, FL), lambda n, i: (n, 0, 0)),  # x (per batch)
                pl.BlockSpec((C_out, CKK_p), lambda n, i: (0, 0)),      # weight
            ],
            out_specs=pl.BlockSpec((1, C_out, TM), lambda n, i: (n, 0, i)),
            scratch_shapes=scratch,
        ),
        compiler_params=pltpu.CompilerParams(
            # batch axis across TensorCores; tile axis "arbitrary" (required
            # for the per-batch w_mod cache and avoids duplicated x DMA).
            dimension_semantics=("parallel", "arbitrary"),
            vmem_limit_bytes=vmem_limit,
        ),
        cost_estimate=cost,
    )(s_exp, x_flat, w2)

    # Drop the K-1 garbage columns per padded-width output row.
    out = out_flat[:, :, :M].reshape(N, C_out, H_out, W_p)[:, :, :, :W_out]
    # TODO(synk): for even K the torch module's trailing reshape to (h, w) is not
    # shape-preserving; we return the true conv output shape (H_out, W_out).
    return out


# ----------------------------------------------------------------------------
# Module-equivalent wrapper
# ----------------------------------------------------------------------------
class Conv2DModPallas:
    def __init__(self, in_channels, out_channels, kernel, demod=True, stride=1,
                 eps=1e-8, use_bf16=True, key=None):
        self.in_channels = in_channels
        self.out_channels = out_channels
        self.kernel = kernel
        self.demod = demod
        self.stride = stride       # only affects padding (matches the module)
        self.eps = eps
        self.use_bf16 = use_bf16
        key = jax.random.PRNGKey(0) if key is None else key
        # kaiming_normal_(a=0, mode='fan_in', nonlinearity='leaky_relu')
        fan_in = in_channels * kernel * kernel
        std = float(np.sqrt(2.0 / fan_in))
        self.weight = std * jax.random.normal(
            key, (out_channels, in_channels, kernel, kernel), dtype=jnp.float32)

    def __call__(self, x, s):
        return conv2dmod_pallas(x, s, self.weight, self.kernel, self.stride,
                                self.demod, self.eps, use_bf16=self.use_bf16)


# ----------------------------------------------------------------------------
# Pure-numpy reference (direct replication of the PyTorch forward)
# ----------------------------------------------------------------------------
def _ref_conv2dmod(x, s, weight, kernel, stride, demod, eps):
    x = np.asarray(x, np.float64)
    s = np.asarray(s, np.float64)
    w = np.asarray(weight, np.float64)
    b, cin, h, wd = x.shape
    cout, _, k, _ = w.shape
    weights = w[None] * (s[:, None, :, None, None] + 1.0)            # (b,co,ci,k,k)
    if demod:
        d = 1.0 / np.sqrt((weights ** 2).sum(axis=(2, 3, 4), keepdims=True) + eps)
        weights = weights * d
    pad = same_padding(k, stride) // 2
    xp = np.pad(x, ((0, 0), (0, 0), (pad, pad), (pad, pad)))
    H_out = h + 2 * pad - k + 1
    W_out = wd + 2 * pad - k + 1
    out = np.zeros((b, cout, H_out, W_out), dtype=np.float64)
    for n in range(b):
        for ky in range(k):
            for kx in range(k):
                patch = xp[n, :, ky:ky + H_out, kx:kx + W_out]        # (ci,Ho,Wo)
                out[n] += np.einsum("oc,chw->ohw", weights[n, :, :, ky, kx], patch)
    return out.astype(np.float32)


if __name__ == "__main__":
    # Small deterministic config: batch=2, Cin=4, Cout=8, 16x16 spatial, 3x3 kernel.
    N, C_in, C_out, H, W, K = 2, 4, 8, 16, 16, 3

    key = jax.random.PRNGKey(0)
    kx_, ks_, kw_ = jax.random.split(key, 3)
    x = jax.random.normal(kx_, (N, C_in, H, W), dtype=jnp.float32)
    s = jax.random.normal(ks_, (N, C_in), dtype=jnp.float32)

    mod = Conv2DModPallas(C_in, C_out, kernel=K, demod=True, stride=1, key=kw_)
    y_ref = _ref_conv2dmod(x, s, mod.weight, K, 1, True, 1e-8)

    # 1) Default path: bf16 MXU + fused im2col patch (small C_in).
    y = jax.block_until_ready(mod(x, s))
    assert y.shape == (N, C_out, H, W), y.shape
    np.testing.assert_allclose(np.asarray(y), y_ref, rtol=5e-2, atol=5e-2)

    # 2) f32 MXU path (tight tolerance against the f64 reference).
    y32 = jax.block_until_ready(
        conv2dmod_pallas(x, s, mod.weight, K, 1, True, 1e-8, use_bf16=False))
    np.testing.assert_allclose(np.asarray(y32), y_ref, rtol=1e-4, atol=1e-4)

    # 3) Per-tap accumulation path (the large-C_in codepath) exercised at small shape.
    y_tap = jax.block_until_ready(
        conv2dmod_pallas(x, s, mod.weight, K, 1, True, 1e-8, force_tap_path=True))
    np.testing.assert_allclose(np.asarray(y_tap), y_ref, rtol=5e-2, atol=5e-2)

    print("KERNEL_OK")
</pallas_src>

<mosaic_0001>
module attributes {stable_mosaic.version = 11 : i64} {
  func.func @kernel(%arg0: i32, %arg1: i32, %arg2: memref<1x1x144xf32, #tpu.memory_space<vmem>>, %arg3: memref<1x16x512xbf16, #tpu.memory_space<vmem>>, %arg4: memref<8x144xf32, #tpu.memory_space<vmem>>, %arg5: memref<1x8x384xf32, #tpu.memory_space<vmem>>, %arg6: memref<8x144xbf16, #tpu.memory_space<vmem>>, %arg7: memref<144x384xbf16, #tpu.memory_space<vmem>>) attributes {dimension_semantics = [#tpu.dimension_semantics<parallel>, #tpu.dimension_semantics<arbitrary>], iteration_bounds = array<i64: 2, 1>, scalar_prefetch = 0 : i64, scratch_operands = 2 : i64, tpu.core_type = #tpu.core_type<tc>, window_params = [{transform_indices = @transform_0, window_bounds = array<i64: 1, 1, 144>}, {transform_indices = @transform_1, window_bounds = array<i64: 1, 16, 512>}, {pipeline_mode = #tpu.pipeline_mode<synchronous>, transform_indices = @transform_2, window_bounds = array<i64: 8, 144>}, {transform_indices = @transform_3, window_bounds = array<i64: 1, 8, 384>}]} {
    %c0_i32 = arith.constant 0 : i32
    %0 = arith.cmpi eq, %arg1, %c0_i32 : i32
    %1 = arith.extui %0 : i1 to i32
    %c0_i32_0 = arith.constant 0 : i32
    %2 = arith.cmpi ne, %1, %c0_i32_0 : i32
    scf.if %2 {
      %c0_36 = arith.constant 0 : index
      %c0_37 = arith.constant 0 : index
      %36 = vector.load %arg4[%c0_36, %c0_37] : memref<8x144xf32, #tpu.memory_space<vmem>>, vector<8x144xf32>
      %c0_38 = arith.constant 0 : index
      %c0_39 = arith.constant 0 : index
      %c0_40 = arith.constant 0 : index
      %37 = vector.load %arg2[%c0_38, %c0_39, %c0_40] : memref<1x1x144xf32, #tpu.memory_space<vmem>>, vector<1x1x144xf32>
      %38 = vector.shape_cast %37 : vector<1x1x144xf32> to vector<1x144xf32>
      %39 = vector.broadcast %38 : vector<1x144xf32> to vector<8x144xf32>
      %40 = arith.mulf %36, %39 : vector<8x144xf32>
      %41 = arith.mulf %40, %40 : vector<8x144xf32>
      %cst_41 = arith.constant dense<0.000000e+00> : vector<8xf32>
      %42 = vector.multi_reduction <add>, %41, %cst_41 [1] : vector<8x144xf32> to vector<8xf32>
      %43 = vector.shape_cast %42 : vector<8xf32> to vector<8x1xf32>
      %cst_42 = arith.constant 9.99999993E-9 : f32
      %44 = vector.broadcast %cst_42 : f32 to vector<8x1xf32>
      %45 = arith.addf %43, %44 : vector<8x1xf32>
      %46 = math.rsqrt %45 : vector<8x1xf32>
      %47 = vector.broadcast %46 : vector<8x1xf32> to vector<8x144xf32>
      %48 = arith.mulf %40, %47 : vector<8x144xf32>
      %49 = arith.truncf %48 : vector<8x144xf32> to vector<8x144xbf16>
      %c0_43 = arith.constant 0 : index
      %c0_44 = arith.constant 0 : index
      %50 = vector.load %arg6[%c0_43, %c0_44] : memref<8x144xbf16, #tpu.memory_space<vmem>>, vector<8x144xbf16>
      tpu.vector_store %arg6[%c0_43, %c0_44], %49 {strides = array<i32>} : memref<8x144xbf16, #tpu.memory_space<vmem>>, vector<8x144xbf16>,
    } else {
    }
    %c0 = arith.constant 0 : index
    %c0_1 = arith.constant 0 : index
    %c0_2 = arith.constant 0 : index
    %3 = vector.load %arg3[%c0, %c0_1, %c0_2] : memref<1x16x512xbf16, #tpu.memory_space<vmem>>, vector<1x16x384xbf16>
    %4 = vector.shape_cast %3 : vector<1x16x384xbf16> to vector<16x384xbf16>
    %c0_3 = arith.constant 0 : index
    %c0_4 = arith.constant 0 : index
    %5 = vector.load %arg7[%c0_3, %c0_4] : memref<144x384xbf16, #tpu.memory_space<vmem>>, vector<16x384xbf16>
    tpu.vector_store %arg7[%c0_3, %c0_4], %4 {strides = array<i32>} : memref<144x384xbf16, #tpu.memory_space<vmem>>, vector<16x384xbf16>,
    %c0_5 = arith.constant 0 : index
    %c0_6 = arith.constant 0 : index
    %c1 = arith.constant 1 : index
    %6 = vector.load %arg3[%c0_5, %c0_6, %c1] : memref<1x16x512xbf16, #tpu.memory_space<vmem>>, vector<1x16x384xbf16>
    %7 = vector.shape_cast %6 : vector<1x16x384xbf16> to vector<16x384xbf16>
    %c16 = arith.constant 16 : index
    %c0_7 = arith.constant 0 : index
    %8 = vector.load %arg7[%c16, %c0_7] : memref<144x384xbf16, #tpu.memory_space<vmem>>, vector<16x384xbf16>
    tpu.vector_store %arg7[%c16, %c0_7], %7 {strides = array<i32>} : memref<144x384xbf16, #tpu.memory_space<vmem>>, vector<16x384xbf16>,
    %c0_8 = arith.constant 0 : index
    %c0_9 = arith.constant 0 : index
    %c2 = arith.constant 2 : index
    %9 = vector.load %arg3[%c0_8, %c0_9, %c2] : memref<1x16x512xbf16, #tpu.memory_space<vmem>>, vector<1x16x384xbf16>
    %10 = vector.shape_cast %9 : vector<1x16x384xbf16> to vector<16x384xbf16>
    %c32 = arith.constant 32 : index
    %c0_10 = arith.constant 0 : index
    %11 = vector.load %arg7[%c32, %c0_10] : memref<144x384xbf16, #tpu.memory_space<vmem>>, vector<16x384xbf16>
    tpu.vector_store %arg7[%c32, %c0_10], %10 {strides = array<i32>} : memref<144x384xbf16, #tpu.memory_space<vmem>>, vector<16x384xbf16>,
    %c0_11 = arith.constant 0 : index
    %c0_12 = arith.constant 0 : index
    %c18 = arith.constant 18 : index
    %12 = vector.load %arg3[%c0_11, %c0_12, %c18] : memref<1x16x512xbf16, #tpu.memory_space<vmem>>, vector<1x16x384xbf16>
    %13 = vector.shape_cast %12 : vector<1x16x384xbf16> to vector<16x384xbf16>
    %c48 = arith.constant 48 : index
    %c0_13 = arith.constant 0 : index
    %14 = vector.load %arg7[%c48, %c0_13] : memref<144x384xbf16, #tpu.memory_space<vmem>>, vector<16x384xbf16>
    tpu.vector_store %arg7[%c48, %c0_13], %13 {strides = array<i32>} : memref<144x384xbf16, #tpu.memory_space<vmem>>, vector<16x384xbf16>,
    %c0_14 = arith.constant 0 : index
    %c0_15 = arith.constant 0 : index
    %c19 = arith.constant 19 : index
    %15 = vector.load %arg3[%c0_14, %c0_15, %c19] : memref<1x16x512xbf16, #tpu.memory_space<vmem>>, vector<1x16x384xbf16>
    %16 = vector.shape_cast %15 : vector<1x16x384xbf16> to vector<16x384xbf16>
    %c64 = arith.constant 64 : index
    %c0_16 = arith.constant 0 : index
    %17 = vector.load %arg7[%c64, %c0_16] : memref<144x384xbf16, #tpu.memory_space<vmem>>, vector<16x384xbf16>
    tpu.vector_store %arg7[%c64, %c0_16], %16 {strides = array<i32>} : memref<144x384xbf16, #tpu.memory_space<vmem>>, vector<16x384xbf16>,
    %c0_17 = arith.constant 0 : index
    %c0_18 = arith.constant 0 : index
    %c20 = arith.constant 20 : index
    %18 = vector.load %arg3[%c0_17, %c0_18, %c20] : memref<1x16x512xbf16, #tpu.memory_space<vmem>>, vector<1x16x384xbf16>
    %19 = vector.shape_cast %18 : vector<1x16x384xbf16> to vector<16x384xbf16>
    %c80 = arith.constant 80 : index
    %c0_19 = arith.constant 0 : index
    %20 = vector.load %arg7[%c80, %c0_19] : memref<144x384xbf16, #tpu.memory_space<vmem>>, vector<16x384xbf16>
    tpu.vector_store %arg7[%c80, %c0_19], %19 {strides = array<i32>} : memref<144x384xbf16, #tpu.memory_space<vmem>>, vector<16x384xbf16>,
    %c0_20 = arith.constant 0 : index
    %c0_21 = arith.constant 0 : index
    %c36 = arith.constant 36 : index
    %21 = vector.load %arg3[%c0_20, %c0_21, %c36] : memref<1x16x512xbf16, #tpu.memory_space<vmem>>, vector<1x16x384xbf16>
    %22 = vector.shape_cast %21 : vector<1x16x384xbf16> to vector<16x384xbf16>
    %c96 = arith.constant 96 : index
    %c0_22 = arith.constant 0 : index
    %23 = vector.load %arg7[%c96, %c0_22] : memref<144x384xbf16, #tpu.memory_space<vmem>>, vector<16x384xbf16>
    tpu.vector_store %arg7[%c96, %c0_22], %22 {strides = array<i32>} : memref<144x384xbf16, #tpu.memory_space<vmem>>, vector<16x384xbf16>,
    %c0_23 = arith.constant 0 : index
    %c0_24 = arith.constant 0 : index
    %c37 = arith.constant 37 : index
    %24 = vector.load %arg3[%c0_23, %c0_24, %c37] : memref<1x16x512xbf16, #tpu.memory_space<vmem>>, vector<1x16x384xbf16>
    %25 = vector.shape_cast %24 : vector<1x16x384xbf16> to vector<16x384xbf16>
    %c112 = arith.constant 112 : index
    %c0_25 = arith.constant 0 : index
    %26 = vector.load %arg7[%c112, %c0_25] : memref<144x384xbf16, #tpu.memory_space<vmem>>, vector<16x384xbf16>
    tpu.vector_store %arg7[%c112, %c0_25], %25 {strides = array<i32>} : memref<144x384xbf16, #tpu.memory_space<vmem>>, vector<16x384xbf16>,
    %c0_26 = arith.constant 0 : index
    %c0_27 = arith.constant 0 : index
    %c38 = arith.constant 38 : index
    %27 = vector.load %arg3[%c0_26, %c0_27, %c38] : memref<1x16x512xbf16, #tpu.memory_space<vmem>>, vector<1x16x384xbf16>
    %28 = vector.shape_cast %27 : vector<1x16x384xbf16> to vector<16x384xbf16>
    %c128 = arith.constant 128 : index
    %c0_28 = arith.constant 0 : index
    %29 = vector.load %arg7[%c128, %c0_28] : memref<144x384xbf16, #tpu.memory_space<vmem>>, vector<16x384xbf16>
    tpu.vector_store %arg7[%c128, %c0_28], %28 {strides = array<i32>} : memref<144x384xbf16, #tpu.memory_space<vmem>>, vector<16x384xbf16>,
    %c0_29 = arith.constant 0 : index
    %c0_30 = arith.constant 0 : index
    %30 = vector.load %arg6[%c0_29, %c0_30] : memref<8x144xbf16, #tpu.memory_space<vmem>>, vector<8x144xbf16>
    %c0_31 = arith.constant 0 : index
    %c0_32 = arith.constant 0 : index
    %31 = vector.load %arg7[%c0_31, %c0_32] : memref<144x384xbf16, #tpu.memory_space<vmem>>, vector<144x384xbf16>
    %cst = arith.constant dense<0.000000e+00> : vector<8x384xf32>
    %32 = tpu.matmul %30, %31, %cst {dimension_numbers = #tpu.dot_dimension_numbers<[1], [0], [0], [1], [0, 0, 1, 1], [], []>} : vector<8x144xbf16>, vector<144x384xbf16>, vector<8x384xf32> -> vector<8x384xf32>
    %c0_33 = arith.constant 0 : index
    %c0_34 = arith.constant 0 : index
    %c0_35 = arith.constant 0 : index
    %33 = vector.load %arg5[%c0_33, %c0_34, %c0_35] : memref<1x8x384xf32, #tpu.memory_space<vmem>>, vector<1x8x384xf32>
    %34 = vector.shape_cast %33 : vector<1x8x384xf32> to vector<8x384xf32>
    %35 = vector.shape_cast %32 : vector<8x384xf32> to vector<1x8x384xf32>
    tpu.vector_store %arg5[%c0_33, %c0_34, %c0_35], %35 {strides = array<i32>} : memref<1x8x384xf32, #tpu.memory_space<vmem>>, vector<1x8x384xf32>,
    return
  }
  func.func @transform_0(%arg0: i32, %arg1: i32) -> (i32, i32, i32) {
    %c0_i32 = arith.constant 0 : i32
    %c0_i32_0 = arith.constant 0 : i32
    %c0_i32_1 = arith.constant 0 : i32
    return %arg0, %c0_i32, %c0_i32_0 : i32, i32, i32
  }
  func.func @transform_1(%arg0: i32, %arg1: i32) -> (i32, i32, i32) {
    %c0_i32 = arith.constant 0 : i32
    %c0_i32_0 = arith.constant 0 : i32
    %c0_i32_1 = arith.constant 0 : i32
    return %arg0, %c0_i32, %c0_i32_0 : i32, i32, i32
  }
  func.func @transform_2(%arg0: i32, %arg1: i32) -> (i32, i32) {
    %c0_i32 = arith.constant 0 : i32
    %c0_i32_0 = arith.constant 0 : i32
    %c0_i32_1 = arith.constant 0 : i32
    return %c0_i32, %c0_i32_0 : i32, i32
  }
  func.func @transform_3(%arg0: i32, %arg1: i32) -> (i32, i32, i32) {
    %c0_i32 = arith.constant 0 : i32
    %c0_i32_0 = arith.constant 0 : i32
    return %arg0, %c0_i32, %arg1 : i32, i32, i32
  }
}

</mosaic_0001>

<bundles_post_ra>
// kernel: tpu_custom_call.1
= control target key start
LH: loop header
LB: loop body
LE: loop exit
PB: predicated region body
PF: predicated region fallthrough
CT: control target
= control target key end

     0   :  { %s1664_s0 = inlined_call_operand.hbm [shape: f32[2,1,144], index: 0, kind: input, shape index: {}]   ;;  %s1665_s1 = inlined_call_operand.hbm [shape: bf16[2,16,512], index: 1, kind: input, shape index: {}]   ;;  %s1666_s2 = inlined_call_operand.hbm [shape: f32[8,144], index: 2, kind: input, shape index: {}]   ;;  %s1667_s3 = inlined_call_operand.hbm [shape: f32[2,8,384], index: 3, kind: output, shape index: {}]  }
   0x1   :  { %1673 = sst [smem:[#allocation16_spill]] %s1664_s0 }
   0x2   :  { %1674 = sst [smem:[#allocation17_spill]] %s1666_s2 }
   0x3   :  { %8 = vsyncpa [#allocation5], 0 }
   0x4   :  { %10 = vsyncpa [#allocation5 + $0x1], 0 }
   0x5   :  { %11 = vsyncpa [#allocation8], 0 }
   0x6   :  { %13 = vsyncpa [#allocation8 + $0x1], 0 }
   0x7   :  { %14 = vsyncpa [#allocation6], 0 }
   0x8   :  { %16 = vsyncpa [#allocation6 + $0x1], 0  ;;  %s1356_s12 = smov 0   ;;  %s1358_s13 = smov 0  }
   0x9   :  { %s1360_s14 = smov 0   ;;  %s1362_s15 = smov 0  }
   0xa   :  { %s1364_s16 = smov 0   ;;  %s1366_s17 = smov 0  }
   0xb LB: > { %s1387_s18 = sadd.s32 4294967295, %s1319_s17   ;;  %s993_s19 = sadd.s32 4294967294, %s1319_s17   ;;  %s1319_s17 = sphi %s1366_s17, %s22_s17   ;;  %s1315_s16 = sphi %s1364_s16, %s1698_s16   ;;  %s1311_s15 = sphi %s1362_s15, %s1697_s15   ;;  %s1307_s14 = sphi %s1360_s14, %s1696_s14   ;;  %s1303_s13 = sphi %s1358_s13, %s1695_s13   ;;  %s1299_s12 = sphi %s1356_s12, %s1694_s12  }
   0xc   : > { %s41_s20 = sadd.s32 1, %s1307_s14  ;;  %p48_p0 = scmp.ne.s32.totalorder %s1307_s14, %s1303_s13 }
   0xd   : > { %p54_p1 = scmp.ne.s32.totalorder %s1303_s13, %s1299_s12  ;;  %p1668_p2 = scmp.eq.s32.totalorder %s1387_s18, 0 }
   0xe   : > { %p127_p3 = scmp.eq.s32.totalorder %s1387_s18, 1  ;;  %p133_p4 = scmp.eq.s32.totalorder %s993_s19, 1 }
   0xf   : > { %p1399_p5 = por %p1668_p2, %p54_p1  ;;  %p994_p6 = scmp.ge.s32.totalorder %s1319_s17, 1 }
  0x10   : > { %p1407_p7 = por %p127_p3, %p48_p0  ;;  %p1411_p8 = por %p133_p4, %p54_p1 }
  0x11   : > { %s1675_s21 = scalar_select %p1399_p5, 1, 0 }
  0x12   : > { %s1676_s22 = scalar_select %p1407_p7, 1, 0 }
  0x13   : > { %s1677_s23 = scalar_select %p1411_p8, 1, 0 }
  0x14   : > { %p140_p9 = scmp.lt.s32.totalorder %s1319_s17, 3  ;;  %s1321_s25 = smov [#allocation9]  }
  0x15   : > { %s153_s26 = sshll.u32 %s1321_s25, 4  ;;  %s34_s27 = sadd.s32 1, %s1315_s16  ;;  %s154_s26 = int_to_ptr.vmem [resolvable:$true] %s153_s26 }
  0x16   : > { %p1417_p11 = pnand %p994_p6, %p140_p9  ;;  %p49_p13 = scmp.eq.s32.totalorder %s1319_s17, 0 }
  0x17   : > { %p1431_p1 = scmp.ge.s32.totalorder %s34_s27, 2  ;;  %p1073_p6 = scmp.lt.s32.totalorder %s1319_s17, 2 }
  0x18   : > { %s1678_s24 = scalar_select %p1417_p11, 1, 0 }
  0x19   : > { %p1057_p12 = pneg %p1417_p11  ;;  %p1438_p4 = por %p49_p13, %p48_p0 }
  0x1a   : > { %s1444_s4 = sand.u32 1, %s1307_s14   ;;  %s1160_s5 = scalar_lea.vmem %s154_s26, 256 }
  0x1b   : > { %p1427_p3 = pnand %p1057_p12, %p1668_p2  ;;  %p1161_p12 = scmp.ne.s32.totalorder %s154_s26, %s1160_s5 }
  0x1c   : > { %p1168_p8 = scmp.lt.s32.totalorder %s154_s26, %s154_s26  ;;  %p1169_p7 = scmp.lt.s32.totalorder %s1160_s5, %s1160_s5 }
  0x1d   : > { %p1151_p9 = pneg %p1427_p3 }
  0x1e   : > { %p1170_p5 = por %p1169_p7, %p1168_p8 }
  0x1f   : > { %p1163_p10 = pnand %p1161_p12, %p1151_p9 }
  0x21   : > { %p1164_p2 = pneg %p1163_p10 }
  0x23   : > { %p1171_p11 = pnand %p1170_p5, %p1164_p2 }
  0x25   : > { %1174 = shalt.err (!%p1171_p11)
}
  0x26   : > { %s1682_s2 = sld [smem:[#allocation17_spill]]  ;;  %s1700_s27 = smov (%p1431_p1, %s34_s27), 0 }
  0x27   : > { %1683 = sst [smem:[#allocation15_spill]] %s1700_s27  ;;  %s997_s8 = sshll.u32 %s1444_s4, 1 }
  0x28   : > { %s38_s9 = ssub.s32 %s1315_s16, %s1700_s27  ;;  %s1042_s10 = sshll.u32 %s1315_s16, 5 }
  0x29   : > { %p39_p0 = scmp.eq.s32.totalorder %s38_s9, 0  ;;  %s1684_s0 = sld [smem:[#allocation16_spill]] }
  0x2a   : > { %s168_s28 = scalar_lea.vmem [#allocation4], %s997_s8  ;;  %p1473_p2 = pnand %p1073_p6, %p1438_p4 }
  0x2b   : > { %s176_s5 = sshll.u32 %s168_s28, 4  ;;  %s1000_s29 = sshll.u32 %s1444_s4, 5  ;;  %s177_s5 = int_to_ptr.vmem [resolvable:$true] %s176_s5 }
  0x2c   : > { %1060 = dma.hbm_to_vmem [thread:$0]  (!%p1427_p3), %s1682_s2, 256, %s154_s26, [#allocation8]  }
  0x2d   : > { %s1467_s6 = scalar_select %p39_p0, %s1307_s14, %s41_s20  }
  0x2e   : > { %s1043_s7 = sshll.u32 %s1315_s16, 9  ;;  %s165_s9 = scalar_lea.sflag [#allocation5], %s1444_s4 }
  0x2f   : > { %s174_s25 = scalar_lea.hbm %s1684_s0, %s1042_s10  ;;  %p1177_p5 = pneg %p1473_p2 }
  0x30   : > { %s1188_s10 = scalar_lea.vmem %s177_s5, 32  ;;  %s1322_s20 = smov [#allocation4]  }
  0x31   : > { %p1189_p7 = scmp.ne.s32.totalorder %s177_s5, %s1188_s10  ;;  %s1193_s30 = sshll.u32 %s1322_s20, 4  ;;  %s1194_s30 = int_to_ptr.vmem [resolvable:$false] %s1193_s30 }
  0x32   : > { %s1195_s8 = scalar_lea.vmem %s1194_s30, 64  ;;  %p1196_p11 = scmp.lt.s32.totalorder %s177_s5, %s1194_s30 }
  0x33   : > { %p1191_p8 = pnand %p1189_p7, %p1177_p5  ;;  %p1197_p13 = scmp.lt.s32.totalorder %s1195_s8, %s1188_s10 }
  0x35   : > { %p1192_p10 = pneg %p1191_p8  ;;  %p1198_p3 = por %p1197_p13, %p1196_p11 }
  0x37   : > { %p1199_p1 = pnand %p1198_p3, %p1192_p10 }
  0x39   : > { %1202 = shalt.err (!%p1199_p1)
}
  0x3a   : > { %1064 = dma.hbm_to_vmem [thread:$0]  (!%p1473_p2), %s174_s25, 32, %s177_s5, %s165_s9  }
  0x3b   : > { %s187_s4 = scalar_lea.vmem [#allocation7], %s1000_s29  ;;  %s183_s19 = sand.u32 1, %s1319_s17  }
  0x3c   : > { %s194_s11 = sshll.u32 %s187_s4, 4  ;;  %s193_s20 = scalar_lea.hbm %s1665_s1, %s1043_s7  ;;  %s195_s11 = int_to_ptr.vmem [resolvable:$true] %s194_s11 }
  0x3d   : > { %s184_s2 = scalar_lea.sflag [#allocation8], %s183_s19  ;;  %s1216_s27 = scalar_lea.vmem %s195_s11, 512 }
  0x3e   : > { %p1217_p4 = scmp.ne.s32.totalorder %s195_s11, %s1216_s27  ;;  %s1323_s10 = smov [#allocation7]  }
  0x3f   : > { %s1221_s30 = sshll.u32 %s1323_s10, 4  ;;  %s1222_s30 = int_to_ptr.vmem [resolvable:$false] %s1221_s30 }
  0x40   : > { %p1219_p6 = pnand %p1217_p4, %p1177_p5  ;;  %s1223_s8 = scalar_lea.vmem %s1222_s30, 1024 }
  0x41   : > { %p1224_p12 = scmp.lt.s32.totalorder %s195_s11, %s1222_s30  ;;  %p1225_p0 = scmp.lt.s32.totalorder %s1223_s8, %s1216_s27 }
  0x42   : > { %p1220_p9 = pneg %p1219_p6 }
  0x43   : > { %p1226_p7 = por %p1225_p0, %p1224_p12 }
  0x45   : > { %p1227_p8 = pnand %p1226_p7, %p1220_p9 }
  0x47   : > { %1230 = shalt.err (!%p1227_p8)
}
  0x48   : > { %s1324_s25 = smov 256   ;;  %s1325_s0 = smov 16  }
  0x49   : > { %1067 = dma.hbm_to_vmem [thread:$0]  (!%p1473_p2), %s193_s20, 512, %s195_s11, %s184_s2, %s1324_s25, %s1324_s25, %s1325_s0  }
  0x4a   : > { %p1686_p10 = scmp.ne.s32.totalorder %s1678_s24, 0 }
  0x4b   : > { %s1499_s5 = sand.u32 (!%p1686_p10), 1, %s1303_s13   ;;  %p1687_p5 = scmp.ne.s32.totalorder (!%p1686_p10), %s1675_s21, 0 }
  0x4c   : > { %206 = sbr.rel (%p1686_p10) target bundleno = 518 (0x206), region = 32  ;;  %s1004_s29 = sshll.u32 (!%p1686_p10), %s1499_s5, 1 }
  0x4d   : > { %s209_s7 = scalar_lea.sflag (!%p1686_p10), [#allocation5], %s1499_s5  ;;  %s1503_s27 = scalar_lea.vmem (!%p1686_p10), [#allocation4], %s1004_s29 }
  0x51   : > { %1282 = dma.done.wait (%p1687_p5), %s209_s7, 32  }
  0x52   : > { %1284 = vsyncadd (%p1687_p5), %s209_s7, 4294967264  ;;  %s217_s2 = sand.u32 1, %s1387_s18   ;;  %s1005_s24 = sshll.u32 %s1499_s5, 5 }
  0x53   : > { %s218_s26 = scalar_lea.sflag [#allocation8], %s217_s2  ;;  %s1511_s9 = scalar_lea.vmem [#allocation7], %s1005_s24 }
  0x54   : > { %1286 = dma.done.wait (%p1687_p5), %s218_s26, 512  }
  0x55   : > { %1288 = vsyncadd (%p1687_p5), %s218_s26, 4294966784  ;;  %p1688_p2 = scmp.eq.s32.totalorder %s1387_s18, 0 }
  0x57   : > { %1290 = dma.done.wait (%p1688_p2), [#allocation8], 256   ;;  %p1689_p11 = pmov %p1688_p2 }
  0x58   : > { %v1522_v0 = vld [vmem:[%s1511_s9 + $0x10] sm:$0xff]  ;;  %v1525_v1 = vld [vmem:[%s1511_s9] sm:$0xff]  ;;  %s1326_s4 = smov 91   ;;  %v520_v2 = vld [vmem:[%s1511_s9 + $0x18] sm:$0xff]  ;;  %v1327_v4 = vmov 0   ;;  %s1328_s18 = smov 92   ;;  %v263_v5 = vlaneseq }
  0x59   : > { %1292 = vsyncadd (%p1689_p11), [#allocation8], 4294967040  ;;  %529 = vrot.lane.b32.xlu1 %v1522_v0, %s1326_s4  ;;  %525 = vrot.lane.b32.xlu0 %v1525_v1, %s1326_s4  ;;  %v518_v3 = vld [vmem:[%s1511_s9 + $0x8] sm:$0xff]  ;;  %s1329_s21 = smov 108   ;;  %v261_v8 = vld [vmem:[%s1503_s27] sm:$0x3] }
  0x5a   : > { %819 = vmatprep.subr.bf16.mxu1 %v1327_v4  ;;  %v264_v6 = vshrl.u32 %v263_v5, 7  ;;  %v260_v11 = vld [vmem:[#allocation9 + $0x8] sm:$0xff]  ;;  %v259_v13 = vld [vmem:[#allocation9] sm:$0xff]  ;;  %s1330_s11 = smov 109   ;;  %vm277_vm0 = vcmask 130048   ;;  %s1331_s19 = smov 110  }
  0x5b   : > { %s1332_s28 = smov 126   ;;  %s1333_s20 = smov 127   ;;  %v299_v20 = vld [vmem:[%s1511_s9 + $0x8] sm:$0xf]  ;;  %v301_v21 = vld [vmem:[%s1511_s9 + $0x18] sm:$0xf] }
  0x5c   : > { %v269_v7 = vsub.s32 1, %v264_v6  ;;  %v265_v9 = vsub.s32 0, %v264_v6  ;;  %303 = vst [vmem:[#allocation3 + $0x8] sm:$0xf] %v299_v20  ;;  %305 = vst [vmem:[#allocation3 + $0x14] sm:$0xf] %v301_v21 }
  0x5d   : > { %531 = vrot.lane.b32.xlu1 %v520_v2, %s1326_s4  ;;  %527 = vrot.lane.b32.xlu0 %v518_v3, %s1326_s4  ;;  %s1334_s10 = smov 90   ;;  %vm294_vm1 = vcmask 1043456   ;;  %vm538_vm2 = vcmask 744448   ;;  %vm503_vm3 = vcmask 752640   ;;  %vm468_vm4 = vcmask 883712   ;;  %s1045_s30 = smul.u32 24, %s1499_s5 }
  0x5e   : > { %v270_v10 = vrot.slane %v261_v8, %v269_v7  ;;  %v266_v12 = vrot.slane %v261_v8, %v265_v9  ;;  %vm433_vm5 = vcmask 891904   ;;  %vm398_vm6 = vcmask 900096   ;;  %s1046_s0 = smul.u32 384, %s1311_s15  ;;  %s863_s15 = scalar_lea.sflag [#allocation6], %s1499_s5 }
  0x5f   : > { %vm363_vm7 = vcmask 1031168   ;;  %vm328_vm8 = vcmask 1039360   ;;  %vm295_vm9 = vcmask 130052   ;;  %vm573_vm11 = vcmask 736256   ;;  %s252_s8 = scalar_lea.vmem [#allocation10], %s1045_s30  ;;  %p1690_p3 = scmp.ne.s32.totalorder %s1676_s22, 0 }
  0x60   : > { %v1537_v14 = vmul.f32 %v270_v10, %v260_v11  ;;  %v1539_v15 = vmul.f32 %v266_v12, %v259_v13  ;;  %vm296_vm10 = vmor %vm295_vm9, %vm294_vm1  ;;  %s879_s25 = sshll.u32 %s252_s8, 4  ;;  %s1618_s27 = scalar_lea.hbm %s1667_s3, %s1046_s0  ;;  %s1613_s25 = int_to_ptr.vmem [resolvable:$true] %s879_s25 }
  0x61   : > { %492 = vrot.lane.b32.xlu1 %v518_v3, %s1328_s18  ;;  %490 = vrot.lane.b32.xlu0 %v1525_v1, %s1328_s18  ;;  %s1231_s2 = scalar_lea.vmem %s1613_s25, 384  ;;  %s1335_s24 = smov [#allocation10]  }
  0x62   : > { %v276_v16 = vmul.f32 %v1537_v14, %v1537_v14  ;;  %v275_v17 = vmul.f32 %v1539_v15, %v1539_v15  ;;  %p1232_p13 = scmp.ne.s32.totalorder %s1613_s25, %s1231_s2  ;;  %s1235_s26 = sshll.u32 %s1335_s24, 4  ;;  %s1236_s26 = int_to_ptr.vmem [resolvable:$false] %s1235_s26 }
  0x63   : > { %s1237_s9 = scalar_lea.vmem %s1236_s26, 768  ;;  %p1238_p6 = scmp.lt.s32.totalorder %s1613_s25, %s1236_s26 }
  0x64   : > { %v278_v18 = vsel %vm277_vm0, %v276_v16, 0.0  ;;  %p1233_p1 = pnand %p1232_p13, %p1690_p3  ;;  %p1239_p9 = scmp.lt.s32.totalorder %s1237_s9, %s1231_s2 }
  0x65   : > { %496 = vrot.lane.b32.xlu1 %v520_v2, %s1328_s18  ;;  %494 = vrot.lane.b32.xlu0 %v1522_v0, %s1328_s18  ;;  %v279_v19 = vadd.f32 %v278_v18, %v275_v17 }
  0x66   : > { %p1234_p4 = pneg %p1233_p1  ;;  %p1240_p12 = por %p1239_p9, %p1238_p6 }
  0x68   : > { %p1241_p0 = pnand %p1240_p12, %p1234_p4 }
  0x69   : > { %455 = vrot.lane.b32.xlu1 %v1525_v1, %s1329_s21 }
  0x6d   : > { %457 = vrot.lane.b32.xlu1 %v518_v3, %s1329_s21 }
  0x71   : > { %459 = vrot.lane.b32.xlu1 %v1522_v0, %s1329_s21 }
  0x75   : > { %461 = vrot.lane.b32.xlu1 %v520_v2, %s1329_s21 }
  0x79   : > { %420 = vrot.lane.b32.xlu1 %v1525_v1, %s1330_s11 }
  0x7d   : > { %422 = vrot.lane.b32.xlu1 %v518_v3, %s1330_s11 }
  0x81   : > { %424 = vrot.lane.b32.xlu1 %v1522_v0, %s1330_s11 }
  0x84   : > { %280 = vadd.xlane.f32.xlu0 %v279_v19 }
  0x85   : > { %426 = vrot.lane.b32.xlu1 %v520_v2, %s1330_s11 }
  0x89   : > { %387 = vrot.lane.b32.xlu1 %v518_v3, %s1331_s19 }
  0x8d   : > { %389 = vrot.lane.b32.xlu1 %v1522_v0, %s1331_s19 }
  0x91   : > { %391 = vrot.lane.b32.xlu1 %v520_v2, %s1331_s19 }
  0x95   : > { %350 = vrot.lane.b32.xlu1 %v1525_v1, %s1332_s28 }
  0x99   : > { %352 = vrot.lane.b32.xlu1 %v518_v3, %s1332_s28 }
  0x9a   : > { %385 = vrot.lane.b32.xlu0 %v1525_v1, %s1331_s19 }
  0x9d   : > { %354 = vrot.lane.b32.xlu1 %v1522_v0, %s1332_s28 }
  0x9e   : > { %356 = vrot.lane.b32.xlu0 %v520_v2, %s1332_s28 }
  0xa1   : > { %314 = vrot.lane.b32.xlu1 %v1525_v1, %s1333_s20 }
  0xa2   : > { %316 = vrot.lane.b32.xlu0 %v518_v3, %s1333_s20 }
  0xa5   : > { %318 = vrot.lane.b32.xlu1 %v1522_v0, %s1333_s20 }
  0xa6   : > { %320 = vrot.lane.b32.xlu0 %v520_v2, %s1333_s20 }
  0xa9   : > { %560 = vrot.lane.b32.xlu1 %v1525_v1, %s1334_s10 }
  0xaa   : > { %562 = vrot.lane.b32.xlu0 %v518_v3, %s1334_s10 }
  0xad   : > { %564 = vrot.lane.b32.xlu1 %v1522_v0, %s1334_s10 }
  0xae   : > { %566 = vrot.lane.b32.xlu0 %v520_v2, %s1334_s10 }
  0xcb   : > { %v530_v22 = vpop.permute.xlu1 %529  ;;  %v526_v23 = vpop.permute.xlu0 %525 }
  0xcc   : > { %v535_v24 = vrot.slane %v530_v22, 4  ;;  %v533_v27 = vrot.slane %v526_v23, 4 }
  0xcf   : > { %v532_v25 = vpop.permute.xlu1 %531  ;;  %v528_v26 = vpop.permute.xlu0 %527 }
  0xd0   : > { %v536_v28 = vrot.slane %v532_v25, 4  ;;  %v534_v29 = vrot.slane %v528_v26, 4 }
  0xd2   : > { %v541_v30 = vsel %vm294_vm1, %v535_v24, %v536_v28  ;;  %v543_v31 = vsel %vm538_vm2, %v532_v25, %v536_v28  ;;  %v537_v32 = vsel %vm294_vm1, %v533_v27, %v534_v29  ;;  %v540_v33 = vsel %vm538_vm2, %v528_v26, %v534_v29 }
  0xd3   : > { %v542_v34 = vsel %vm538_vm2, %v530_v22, %v541_v30  ;;  %551 = vst [vmem:[#allocation3 + $0xbc] sm:$0xf] %v543_v31  ;;  %v539_v35 = vsel %vm538_vm2, %v526_v23, %v537_v32  ;;  %549 = vst [vmem:[#allocation3 + $0xb0] sm:$0xf] %v540_v33  ;;  %v493_v36 = vpop.permute.xlu1 %492  ;;  %v491_v37 = vpop.permute.xlu0 %490 }
  0xd4   : > { %v499_v38 = vrot.slane %v493_v36, 4  ;;  %v498_v39 = vrot.slane %v491_v37, 4  ;;  %v1032_v40 = vcombine.high %v539_v35, %v542_v34  ;;  %v1031_v41 = vcombine.low %v539_v35, %v542_v34 }
  0xd6   : > { %v505_v42 = vsel %vm503_vm3, %v493_v36, %v499_v38  ;;  %v502_v43 = vsel %vm294_vm1, %v498_v39, %v499_v38  ;;  %778 = vmatprep.subr.bf16.mxu0 %v1032_v40 }
  0xd7   : > { %514 = vst [vmem:[#allocation3 + $0x98] sm:$0xf] %v505_v42  ;;  %v504_v44 = vsel %vm503_vm3, %v491_v37, %v502_v43  ;;  %v497_v45 = vpop.permute.xlu1 %496  ;;  %v495_v46 = vpop.permute.xlu0 %494  ;;  %779 = vmatpush1.bf16.msra.mxu0 %v1031_v41 }
  0xd8   : > { %v501_v47 = vrot.slane %v497_v45, 4  ;;  %v500_v48 = vrot.slane %v495_v46, 4 }
  0xda   : > { %v508_v49 = vsel %vm503_vm3, %v497_v45, %v501_v47  ;;  %v506_v50 = vsel %vm294_vm1, %v500_v48, %v501_v47  ;;  %v1136_v51 = vld [vmem:[#allocation3 + $0xb0] ss:$12 sps:$4 sm:$0xff]  }
  0xdb   : > { %516 = vst [vmem:[#allocation3 + $0xa4] sm:$0xf] %v508_v49  ;;  %v507_v52 = vsel %vm503_vm3, %v495_v46, %v506_v50  ;;  %v456_v53 = vpop.permute.xlu1 %455  ;;  %820 = vmatpush1.bf16.msra.mxu1 %v1136_v51 }
  0xdc   : > { %v1029_v54 = vcombine.high %v504_v44, %v507_v52  ;;  %v1028_v55 = vcombine.low %v504_v44, %v507_v52  ;;  %821 = vmatprep.subr.bf16.mxu1 %v1327_v4  ;;  %v463_v56 = vrot.slane %v456_v53, 4 }
  0xde   : > { %780 = vmatprep.subr.bf16.mxu0 %v1029_v54 }
  0xdf   : > { %v458_v57 = vpop.permute.xlu1 %457  ;;  %781 = vmatpush1.bf16.msra.mxu0 %v1028_v55 }
  0xe0   : > { %v464_v58 = vrot.slane %v458_v57, 4 }
  0xe2   : > { %v467_v59 = vsel %vm294_vm1, %v463_v56, %v464_v58  ;;  %v470_v60 = vsel %vm468_vm4, %v458_v57, %v464_v58  ;;  %v1137_v61 = vld [vmem:[#allocation3 + $0x98] ss:$12 sps:$4 sm:$0xff]  }
  0xe3   : > { %v469_v62 = vsel %vm468_vm4, %v456_v53, %v467_v59  ;;  %479 = vst [vmem:[#allocation3 + $0x80] sm:$0xf] %v470_v60  ;;  %v460_v63 = vpop.permute.xlu1 %459  ;;  %822 = vmatpush1.bf16.msra.mxu1 %v1137_v61 }
  0xe4   : > { %823 = vmatprep.subr.bf16.mxu1 %v1327_v4  ;;  %v465_v2 = vrot.slane %v460_v63, 4 }
  0xe7   : > { %v462_v3 = vpop.permute.xlu1 %461 }
  0xe8   : > { %v466_v5 = vrot.slane %v462_v3, 4 }
  0xea   : > { %v471_v6 = vsel %vm294_vm1, %v465_v2, %v466_v5  ;;  %v473_v7 = vsel %vm468_vm4, %v462_v3, %v466_v5 }
  0xeb   : > { %v472_v8 = vsel %vm468_vm4, %v460_v63, %v471_v6  ;;  %481 = vst [vmem:[#allocation3 + $0x8c] sm:$0xf] %v473_v7  ;;  %v421_v9 = vpop.permute.xlu1 %420 }
  0xec   : > { %v1026_v10 = vcombine.high %v469_v62, %v472_v8  ;;  %v1025_v11 = vcombine.low %v469_v62, %v472_v8  ;;  %v428_v12 = vrot.slane %v421_v9, 4 }
  0xee   : > { %782 = vmatprep.subr.bf16.mxu0 %v1026_v10 }
  0xef   : > { %v423_v13 = vpop.permute.xlu1 %422  ;;  %783 = vmatpush1.bf16.msra.mxu0 %v1025_v11 }
  0xf0   : > { %v429_v16 = vrot.slane %v423_v13, 4 }
  0xf2   : > { %v432_v17 = vsel %vm294_vm1, %v428_v12, %v429_v16  ;;  %v435_v18 = vsel %vm433_vm5, %v423_v13, %v429_v16  ;;  %v1138_v19 = vld [vmem:[#allocation3 + $0x80] ss:$12 sps:$4 sm:$0xff]  }
  0xf3   : > { %v434_v20 = vsel %vm433_vm5, %v421_v9, %v432_v17  ;;  %444 = vst [vmem:[#allocation3 + $0x68] sm:$0xf] %v435_v18  ;;  %v425_v21 = vpop.permute.xlu1 %424  ;;  %824 = vmatpush1.bf16.msra.mxu1 %v1138_v19 }
  0xf4   : > { %825 = vmatprep.subr.bf16.mxu1 %v1327_v4  ;;  %v430_v22 = vrot.slane %v425_v21, 4 }
  0xf7   : > { %v427_v23 = vpop.permute.xlu1 %426 }
  0xf8   : > { %v431_v24 = vrot.slane %v427_v23, 4 }
  0xfa   : > { %v436_v25 = vsel %vm294_vm1, %v430_v22, %v431_v24  ;;  %v438_v26 = vsel %vm433_vm5, %v427_v23, %v431_v24 }
  0xfb   : > { %v437_v27 = vsel %vm433_vm5, %v425_v21, %v436_v25  ;;  %446 = vst [vmem:[#allocation3 + $0x74] sm:$0xf] %v438_v26  ;;  %v388_v28 = vpop.permute.xlu1 %387 }
  0xfc   : > { %v394_v29 = vrot.slane %v388_v28, 4  ;;  %v1023_v30 = vcombine.high %v434_v20, %v437_v27  ;;  %v1022_v31 = vcombine.low %v434_v20, %v437_v27 }
  0xfe   : > { %v400_v32 = vsel %vm398_vm6, %v388_v28, %v394_v29  ;;  %784 = vmatprep.subr.bf16.mxu0 %v1023_v30 }
  0xff   : > { %409 = vst [vmem:[#allocation3 + $0x50] sm:$0xf] %v400_v32  ;;  %v390_v33 = vpop.permute.xlu1 %389  ;;  %785 = vmatpush1.bf16.msra.mxu0 %v1022_v31  ;;  %v1011_v31 = vcombine.high %v1525_v1, %v1522_v0 }
 0x100   : > { %v395_v34 = vrot.slane %v390_v33, 4 }
 0x102   : > { %v1139_v35 = vld [vmem:[#allocation3 + $0x68] ss:$12 sps:$4 sm:$0xff]  }
 0x103   : > { %v392_v36 = vpop.permute.xlu1 %391  ;;  %826 = vmatpush1.bf16.msra.mxu1 %v1139_v35 }
 0x104   : > { %v396_v37 = vrot.slane %v392_v36, 4  ;;  %827 = vmatprep.subr.bf16.mxu1 %v1327_v4 }
 0x106   : > { %v401_v38 = vsel %vm294_vm1, %v395_v34, %v396_v37  ;;  %v403_v39 = vsel %vm398_vm6, %v392_v36, %v396_v37  ;;  %v1010_v37 = vcombine.low %v1525_v1, %v1522_v0 }
 0x107   : > { %v402_v40 = vsel %vm398_vm6, %v390_v33, %v401_v38  ;;  %411 = vst [vmem:[#allocation3 + $0x5c] sm:$0xf] %v403_v39  ;;  %v351_v41 = vpop.permute.xlu1 %350 }
 0x108   : > { %v358_v42 = vrot.slane %v351_v41, 4 }
 0x10b   : > { %v353_v43 = vpop.permute.xlu1 %352 }
 0x10c   : > { %v359_v44 = vrot.slane %v353_v43, 4 }
 0x10d   : > { %v281_v45 = vpop.xlane.xlu0 %280 }
 0x10e   : > { %v362_v46 = vsel %vm294_vm1, %v358_v42, %v359_v44  ;;  %v365_v47 = vsel %vm363_vm7, %v353_v43, %v359_v44  ;;  %v282_v48 = vadd.f32 1e-08, %v281_v45  ;;  %v1140_v49 = vld [vmem:[#allocation3 + $0x50] ss:$12 sps:$4 sm:$0xff]   ;;  %v1145_v45 = vld [vmem:[#allocation3 + $0x8] ss:$12 sps:$4 sm:$0xff]  }
 0x10f   : > { %v364_v50 = vsel %vm363_vm7, %v351_v41, %v362_v46  ;;  %374 = vst [vmem:[#allocation3 + $0x38] sm:$0xf] %v365_v47  ;;  %v355_v51 = vpop.permute.xlu1 %354  ;;  %828 = vmatpush1.bf16.msra.mxu1 %v1140_v49 }
 0x110   : > { %1147 = vrsqrt.f32 %v282_v48  ;;  %829 = vmatprep.subr.bf16.mxu1 %v1327_v4  ;;  %v360_v56 = vrot.slane %v355_v51, 4 }
 0x111   : > { %v386_v52 = vpop.permute.xlu0 %385 }
 0x112   : > { %v393_v53 = vrot.slane %v386_v52, 4 }
 0x113   : > { %v315_v54 = vpop.permute.xlu1 %314 }
 0x114   : > { %v397_v55 = vsel %vm294_vm1, %v393_v53, %v394_v29  ;;  %v322_v3 = vrot.slane %v315_v54, 4 }
 0x115   : > { %v399_v57 = vsel %vm398_vm6, %v386_v52, %v397_v55  ;;  %v357_v58 = vpop.permute.xlu0 %356 }
 0x116   : > { %v361_v59 = vrot.slane %v357_v58, 4  ;;  %v1020_v60 = vcombine.high %v399_v57, %v402_v40  ;;  %v1019_v61 = vcombine.low %v399_v57, %v402_v40 }
 0x117   : > { %v319_v62 = vpop.permute.xlu1 %318 }
 0x118   : > { %v366_v63 = vsel %vm294_vm1, %v360_v56, %v361_v59  ;;  %v368_v2 = vsel %vm363_vm7, %v357_v58, %v361_v59  ;;  %786 = vmatprep.subr.bf16.mxu0 %v1020_v60  ;;  %v324_v13 = vrot.slane %v319_v62, 4 }
 0x119   : > { %v367_v5 = vsel %vm363_vm7, %v355_v51, %v366_v63  ;;  %376 = vst [vmem:[#allocation3 + $0x44] sm:$0xf] %v368_v2  ;;  %v317_v6 = vpop.permute.xlu0 %316  ;;  %787 = vmatpush1.bf16.msra.mxu0 %v1019_v61 }
 0x11a   : > { %v323_v7 = vrot.slane %v317_v6, 4  ;;  %v1017_v8 = vcombine.high %v364_v50, %v367_v5  ;;  %v1016_v9 = vcombine.low %v364_v50, %v367_v5 }
 0x11b   : > { %v561_v10 = vpop.permute.xlu1 %560 }
 0x11c   : > { %v327_v11 = vsel %vm294_vm1, %v322_v3, %v323_v7  ;;  %v330_v12 = vsel %vm328_vm8, %v317_v6, %v323_v7  ;;  %788 = vmatprep.subr.bf16.mxu0 %v1017_v8  ;;  %v568_v25 = vrot.slane %v561_v10, 4 }
 0x11d   : > { %v1148_v16 = vpop.eup %1147  ;;  %v329_v17 = vsel %vm328_vm8, %v315_v54, %v327_v11  ;;  %339 = vst [vmem:[#allocation3 + $0x20] sm:$0xf] %v330_v12  ;;  %v321_v18 = vpop.permute.xlu0 %320  ;;  %789 = vmatpush1.bf16.msra.mxu0 %v1016_v9 }
 0x11e   : > { %v284_v19 = vmul.f32 %v1148_v16, %v1539_v15  ;;  %v285_v20 = vmul.f32 %v1148_v16, %v1537_v14  ;;  %v325_v21 = vrot.slane %v321_v18, 4 }
 0x11f   : > { %v565_v29 = vpop.permute.xlu1 %564 }
 0x120   : > { %v1044_v22 = vpack.c.bf16 %v285_v20, %v284_v19  ;;  %v331_v23 = vsel %vm294_vm1, %v324_v13, %v325_v21  ;;  %v333_v24 = vsel %vm328_vm8, %v321_v18, %v325_v21  ;;  %v1141_v26 = vld [vmem:[#allocation3 + $0x38] ss:$12 sps:$4 sm:$0xff]   ;;  %v570_v34 = vrot.slane %v565_v29, 4 }
 0x121   : > { %v332_v27 = vsel %vm328_vm8, %v319_v62, %v331_v23  ;;  %341 = vst [vmem:[#allocation3 + $0x2c] sm:$0xf] %v333_v24  ;;  %v563_v28 = vpop.permute.xlu0 %562  ;;  %830 = vmatpush1.bf16.msra.mxu1 %v1141_v26 }
 0x122   : > { %297 = vst.msk [vmem:[#allocation2] sm:$0xff] %vm296_vm10, %v1044_v22  ;;  %v569_v15 = vrot.slane %v563_v28, 4  ;;  %v1014_v14 = vcombine.high %v329_v17, %v332_v27  ;;  %v1013_v30 = vcombine.low %v329_v17, %v332_v27  ;;  %831 = vmatprep.subr.bf16.mxu1 %v1327_v4 }
 0x124   : > { %v572_v32 = vsel %vm294_vm1, %v568_v25, %v569_v15  ;;  %v575_v33 = vsel %vm573_vm11, %v563_v28, %v569_v15  ;;  %790 = vmatprep.subr.bf16.mxu0 %v1014_v14 }
 0x125   : > { %v574_v35 = vsel %vm573_vm11, %v561_v10, %v572_v32  ;;  %584 = vst [vmem:[#allocation3 + $0xc8] sm:$0xf] %v575_v33  ;;  %v567_v36 = vpop.permute.xlu0 %566  ;;  %791 = vmatpush1.bf16.msra.mxu0 %v1013_v30 }
 0x126   : > { %v571_v38 = vrot.slane %v567_v36, 4  ;;  %792 = vmatprep.subr.bf16.mxu0 %v1011_v31 }
 0x128   : > { %v576_v39 = vsel %vm294_vm1, %v570_v34, %v571_v38  ;;  %v578_v40 = vsel %vm573_vm11, %v567_v36, %v571_v38  ;;  %v1142_v41 = vld [vmem:[#allocation3 + $0x20] ss:$12 sps:$4 sm:$0xff]  }
 0x129   : > { %v577_v42 = vsel %vm573_vm11, %v565_v29, %v576_v39  ;;  %586 = vst [vmem:[#allocation3 + $0xd4] sm:$0xf] %v578_v40  ;;  %v587_v43 = vld [vmem:[#allocation2] sm:$0xff]  ;;  %793 = vmatpush1.bf16.msra.mxu0 %v1010_v37  ;;  %832 = vmatpush1.bf16.msra.mxu1 %v1142_v41 }
 0x12a   : > { %v1009_v44 = vcombine.high %v587_v43, %v587_v43  ;;  %v1035_v46 = vcombine.high %v574_v35, %v577_v42  ;;  %v1034_v47 = vcombine.low %v574_v35, %v577_v42  ;;  %833 = vmatprep.subr.bf16.mxu1 %v1327_v4  ;;  %v1008_v0 = vcombine.low %v587_v43, %v587_v43 }
 0x12c   : > { %1037 = vmatprep.mubr.msk.bf16.mxu0 %vm277_vm0, %v1009_v44  ;;  %1038 = vmatprep.mubr.msk.bf16.mxu1 %vm277_vm0, %v1009_v44 }
 0x12d   : > { %808 = vmatprep.subr.bf16.mxu0 %v1035_v46  ;;  %834 = vmatpush1.bf16.msra.mxu1 %v1145_v45 }
 0x12e   : > { %809 = vmatpush2.bf16.msra.mxu0 %v1034_v47  ;;  %849 = vmatprep.subr.bf16.mxu1 %v1327_v4 }
 0x130   : > { %v1146_v1 = vld [vmem:[#allocation3 + $0xc8] ss:$12 sps:$4 sm:$0xff]  }
 0x131   : > { %811 = vmatmul.mubr.bf16.vlgmr.msra.gmra.mxu0 %v1008_v0  ;;  %850 = vmatpush2.bf16.msra.mxu1 %v1146_v1 }
 0x134   : > { %852 = vmatmul.mubr.bf16.vlgmr.msra.gmra.mxu1 %v1008_v0 }
 0x1f1   : > { %v812_v48 = vpop.f32.mrf.mxu0 }
 0x1f2   : > { %859 = vst [vmem:[%s252_s8] sm:$0xff] %v812_v48 }
 0x1f3   : > { %v814_v49 = vpop.f32.mrf.mxu0 }
 0x1f4   : > { %860 = vst [vmem:[%s252_s8 + $0x8] sm:$0xff] %v814_v49  ;;  %v853_v4 = vpop.f32.mrf.mxu1 }
 0x1f5   : > { %v816_v50 = vpop.f32.mrf.mxu0  ;;  %861 = vst [vmem:[%s252_s8 + $0x10] sm:$0xff] %v853_v4 }
 0x1f6   : > { %v855_v51 = vpop.f32.mrf.mxu1 }
 0x1f7   : > { %v817_v52 = vpop.f32.mrf.mxu0 }
 0x1f8   : > { %1244 = shalt.err (!%p1241_p0)
}
 0x1f9   : > { %s1245_s4 = scalar_lea.hbm %s1618_s27, 384  ;;  %s1249_s21 = scalar_lea.hbm %s1667_s3, 768 }
 0x1fa   : > { %p1246_p7 = scmp.ne.s32.totalorder %s1618_s27, %s1245_s4  ;;  %p1250_p5 = scmp.lt.s32.totalorder %s1618_s27, %s1667_s3 }
 0x1fb   : > { %p1251_p2 = scmp.lt.s32.totalorder %s1249_s21, %s1245_s4 }
 0x1fc   : > { %p1247_p8 = pnand %p1246_p7, %p1690_p3 }
 0x1fd   : > { %p1252_p11 = por %p1251_p2, %p1250_p5 }
 0x1fe   : > { %p1248_p10 = pneg %p1247_p8 }
 0x200   : > { %p1253_p13 = pnand %p1252_p11, %p1248_p10 }
 0x202   : > { %1256 = shalt.err (!%p1253_p13)
}
 0x203   : > { %1055 = dma.vmem_to_hbm [thread:$0]  (%p1690_p3), %s1613_s25, 384, %s1618_s27, %s863_s15   ;;  %v856_v53 = vpop.f32.mrf.mxu1 }
 0x205   : > { %v857_v54 = vpop.f32.mrf.mxu1 }
 0x206 PF: > { %s891_s28 = sand.u32 1, %s1299_s12   ;;  %p1691_p1 = scmp.ne.s32.totalorder %s1677_s23, 0 }
 0x207   : > { %p1692_p4 = scmp.ge.s32.totalorder %s1319_s17, 2  ;;  %s892_s20 = scalar_lea.sflag [#allocation6], %s891_s28 }
 0x209   : > { %p1069_p6 = pnand %p1692_p4, %p1691_p1 }
 0x20b   : > { %p1070_p9 = pneg %p1069_p6 }
 0x20d   : > { %1294 = dma.done.wait (%p1070_p9), %s892_s20, 384  }
 0x20e   : > { %1296 = vsyncadd (%p1070_p9), %s892_s20, 4294966912  ;;  %s22_s17 = sadd.s32 1, %s1319_s17   ;;  %s1693_s22 = sld [smem:[#allocation15_spill]] }
 0x20f   : > { %p19_p12 = scmp.ge.s32.totalorder %s22_s17, 4   ;;  %s1694_s12 = smov %s1303_s13 }
 0x210   : > { %s1695_s13 = smov %s1307_s14  ;;  %s1696_s14 = smov %s1467_s6 }
 0x211   : > { %s1697_s15 = smov %s1315_s16  ;;  %21 = sbr.rel (!%p19_p12) target bundleno = 11 (0xb), region = 98 }
 0x214   : > { %s1698_s16 = smov %s1693_s22 }
 0x216   :  { %897 = vsyncpa [#allocation5], 1 }
 0x217   :  { %899 = vsyncpa [#allocation5 + $0x1], 1 }
 0x218   :  { %900 = vsyncpa [#allocation8], 1 }
 0x219   :  { %902 = vsyncpa [#allocation8 + $0x1], 1 }
 0x21a   :  { %903 = vsyncpa [#allocation6], 1 }
 0x21b   :  { %905 = vsyncpa [#allocation6 + $0x1], 1 }

</bundles_post_ra>
